<compile_context>
chip_gen: v6e
topology: v6e:2x2x1
jax: 0.10.0
libtpu: 0.0.40
codegen_flags: <defaults>
</compile_context>

<pallas_src>
import functools
import numpy as np
import jax
import jax.numpy as jnp
from jax.experimental import pallas as pl
from jax.experimental.pallas import tpu as pltpu

# ---------------- toy config (consistent with the module) ----------------
B = 2              # batch
S = 8              # seq len
H = 32             # hidden_size
I = 128            # intermediate_size
M = B * S          # folded batch*seq rows -> MXU M dimension

TM = 8             # rows per M tile   (2 M-steps at the toy shape)
TI = 64            # intermediate cols per I tile (2 reduction steps at toy shape)


def llama_mlp_kernel(x_ref, wgu_ref, wd_ref, out_ref, acc_ref, *, ti):
    """One (tm x ti) step of down( silu(gate(x)) * up(x) ).

    grid = (M // tm, I // ti); axis 1 is the reduction over intermediate_size,
    accumulated into an f32 VMEM scratch that persists across the I steps.
    """
    j = pl.program_id(1)

    @pl.when(j == 0)
    def _():
        acc_ref[...] = jnp.zeros_like(acc_ref)

    # Fused gate+up projection for this I-tile: (tm, H) @ (H, 2*ti) -> (tm, 2*ti).
    # x is already bf16 (cast once in the wrapper); f32 accumulation on the MXU.
    gu = jnp.dot(x_ref[...], wgu_ref[...], preferred_element_type=jnp.float32)
    gate = gu[:, :ti]
    up = gu[:, ti:]

    # SiLU + gating product in f32 (portable: v5e has no bf16 VPU/EUP).
    h = jax.nn.silu(gate) * up                                    # (tm, ti) f32

    # Partial down projection: (tm, ti) @ (ti, H), accumulate in f32.
    acc_ref[...] += jnp.dot(h.astype(jnp.bfloat16), wd_ref[...],
                            preferred_element_type=jnp.float32)

    @pl.when(j == pl.num_programs(1) - 1)
    def _():
        out_ref[...] = acc_ref[...].astype(out_ref.dtype)


def prepare_weights(wg, wu, wd, *, ti=TI):
    """One-time weight prep (weight-load time, not per call).

    PyTorch nn.Linear layout: wg/wu (I, H), wd (H, I).
    Returns:
      wgu : (H, 2*I) bf16 with gate/up columns interleaved at ti granularity so
            that grid step j fetches ONE contiguous (H, 2*ti) block containing
            [gate_tile_j | up_tile_j].
      wd_t: (I, H) bf16 (down_proj weight, transposed for row-major matmul).
    """
    i_dim, h_dim = wg.shape
    n_i = i_dim // ti
    wg_r = wg.T.reshape(h_dim, n_i, ti)            # (H, n_i, ti)
    wu_r = wu.T.reshape(h_dim, n_i, ti)
    wgu = jnp.stack([wg_r, wu_r], axis=2).reshape(h_dim, 2 * i_dim)
    return wgu.astype(jnp.bfloat16), wd.T.astype(jnp.bfloat16)


def llama_mlp_pallas(x, wgu, wd_t, *, tm=TM, ti=TI):
    """x: (B, S, H) f32/bf16.  wgu, wd_t: pre-fused bf16 weights from prepare_weights."""
    b, s, h = x.shape
    m = b * s
    i = wd_t.shape[0]
    x2d = x.reshape(m, h).astype(jnp.bfloat16)     # cast activations once, wrapper-side

    grid = (m // tm, i // ti)

    cost = pl.CostEstimate(
        flops=6 * m * h * i,                  # 4*M*H*I (fused gate+up) + 2*M*I*H (down)
        transcendentals=m * i,                # one exp per SiLU element
        bytes_accessed=(m * h * 2             # x (bf16)
                        + 3 * h * i * 2       # fused gate/up + down weights (bf16)
                        + m * h * 4),         # f32 output
    )

    out2d = pl.pallas_call(
        functools.partial(llama_mlp_kernel, ti=ti),
        out_shape=jax.ShapeDtypeStruct((m, h), jnp.float32),
        grid_spec=pltpu.PrefetchScalarGridSpec(
            num_scalar_prefetch=0,
            grid=grid,
            in_specs=[
                pl.BlockSpec((tm, h), lambda mi, ji: (mi, 0)),        # x tile
                pl.BlockSpec((h, 2 * ti), lambda mi, ji: (0, ji)),    # fused [gate|up] tile
                pl.BlockSpec((ti, h), lambda mi, ji: (ji, 0)),        # down-proj tile
            ],
            out_specs=pl.BlockSpec((tm, h), lambda mi, ji: (mi, 0)),  # resident over I
            scratch_shapes=[pltpu.VMEM((tm, h), jnp.float32)],        # f32 accumulator
        ),
        compiler_params=pltpu.CompilerParams(
            # M-tiles are independent (sharded across v7x's two TensorCores);
            # the I axis carries the accumulator, so it must be "arbitrary".
            dimension_semantics=("parallel", "arbitrary"),
        ),
        cost_estimate=cost,
    )(x2d, wgu, wd_t)
    return out2d.reshape(b, s, h)


# ---------------- plain-JAX reference (mirrors the PyTorch forward, f32) -----
def reference_forward(x, wg, wu, wd):
    gate = x @ wg.T                          # (B, S, I)
    up = x @ wu.T                            # (B, S, I)
    return (jax.nn.silu(gate) * up) @ wd.T   # (B, S, H)


if __name__ == "__main__":
    key = jax.random.PRNGKey(0)
    k_x, k_g, k_u, k_d = jax.random.split(key, 4)

    x = jax.random.normal(k_x, (B, S, H), dtype=jnp.float32)

    std = 0.02
    wg = jax.random.normal(k_g, (I, H), dtype=jnp.float32) * std   # gate_proj.weight (out, in)
    wu = jax.random.normal(k_u, (I, H), dtype=jnp.float32) * std   # up_proj.weight
    wd = jax.random.normal(k_d, (H, I), dtype=jnp.float32) * std   # down_proj.weight

    # One-time weight preparation (would happen at model-load time).
    wgu, wd_t = prepare_weights(wg, wu, wd, ti=TI)
    wgu = jax.block_until_ready(wgu)
    wd_t = jax.block_until_ready(wd_t)

    out = llama_mlp_pallas(x, wgu, wd_t, tm=TM, ti=TI)
    out = jax.block_until_ready(out)

    ref = reference_forward(x, wg, wu, wd)
    # bf16 MXU operands / activations with f32 accumulation vs. pure-f32 reference.
    np.testing.assert_allclose(np.asarray(out), np.asarray(ref), rtol=5e-2, atol=1e-3)

    print("KERNEL_OK")
</pallas_src>

<mosaic_0001>
module attributes {stable_mosaic.version = 11 : i64} {
  func.func @llama_mlp_kernel(%arg0: i32, %arg1: i32, %arg2: memref<8x32xbf16, #tpu.memory_space<vmem>>, %arg3: memref<32x128xbf16, #tpu.memory_space<vmem>>, %arg4: memref<64x32xbf16, #tpu.memory_space<vmem>>, %arg5: memref<8x32xf32, #tpu.memory_space<vmem>>, %arg6: memref<8x32xf32, #tpu.memory_space<vmem>>) attributes {dimension_semantics = [#tpu.dimension_semantics<parallel>, #tpu.dimension_semantics<arbitrary>], iteration_bounds = array<i64: 2, 2>, scalar_prefetch = 0 : i64, scratch_operands = 1 : i64, tpu.core_type = #tpu.core_type<tc>, window_params = [{transform_indices = @transform_0, window_bounds = array<i64: 8, 32>}, {transform_indices = @transform_1, window_bounds = array<i64: 32, 128>}, {transform_indices = @transform_2, window_bounds = array<i64: 64, 32>}, {transform_indices = @transform_3, window_bounds = array<i64: 8, 32>}]} {
    %c0_i32 = arith.constant 0 : i32
    %0 = arith.cmpi eq, %arg1, %c0_i32 : i32
    %1 = arith.extui %0 : i1 to i32
    %c0_i32_0 = arith.constant 0 : i32
    %2 = arith.cmpi ne, %1, %c0_i32_0 : i32
    scf.if %2 {
      %cst_13 = arith.constant 0.000000e+00 : f32
      %24 = vector.broadcast %cst_13 : f32 to vector<8x32xf32>
      %c0_14 = arith.constant 0 : index
      %c0_15 = arith.constant 0 : index
      %25 = vector.load %arg6[%c0_14, %c0_15] : memref<8x32xf32, #tpu.memory_space<vmem>>, vector<8x32xf32>
      tpu.vector_store %arg6[%c0_14, %c0_15], %24 {strides = array<i32>} : memref<8x32xf32, #tpu.memory_space<vmem>>, vector<8x32xf32>,
    } else {
    }
    %c0 = arith.constant 0 : index
    %c0_1 = arith.constant 0 : index
    %3 = vector.load %arg2[%c0, %c0_1] : memref<8x32xbf16, #tpu.memory_space<vmem>>, vector<8x32xbf16>
    %c0_2 = arith.constant 0 : index
    %c0_3 = arith.constant 0 : index
    %4 = vector.load %arg3[%c0_2, %c0_3] : memref<32x128xbf16, #tpu.memory_space<vmem>>, vector<32x128xbf16>
    %cst = arith.constant dense<0.000000e+00> : vector<8x128xf32>
    %5 = tpu.matmul %3, %4, %cst {dimension_numbers = #tpu.dot_dimension_numbers<[1], [0], [0], [1], [0, 0, 1, 1], [], []>} : vector<8x32xbf16>, vector<32x128xbf16>, vector<8x128xf32> -> vector<8x128xf32>
    %6 = vector.extract_strided_slice %5 {offsets = [0, 0], sizes = [8, 64], strides = [1, 1]} : vector<8x128xf32> to vector<8x64xf32>
    %7 = vector.extract_strided_slice %5 {offsets = [0, 64], sizes = [8, 64], strides = [1, 1]} : vector<8x128xf32> to vector<8x64xf32>
    %8 = arith.negf %6 : vector<8x64xf32>
    %9 = math.exp %8 : vector<8x64xf32>
    %cst_4 = arith.constant 1.000000e+00 : f32
    %10 = vector.broadcast %cst_4 : f32 to vector<8x64xf32>
    %11 = arith.addf %10, %9 : vector<8x64xf32>
    %12 = arith.divf %10, %11 : vector<8x64xf32>
    %13 = arith.mulf %6, %12 : vector<8x64xf32>
    %14 = arith.mulf %13, %7 : vector<8x64xf32>
    %c0_5 = arith.constant 0 : index
    %c0_6 = arith.constant 0 : index
    %15 = vector.load %arg6[%c0_5, %c0_6] : memref<8x32xf32, #tpu.memory_space<vmem>>, vector<8x32xf32>
    %16 = arith.truncf %14 : vector<8x64xf32> to vector<8x64xbf16>
    %c0_7 = arith.constant 0 : index
    %c0_8 = arith.constant 0 : index
    %17 = vector.load %arg4[%c0_7, %c0_8] : memref<64x32xbf16, #tpu.memory_space<vmem>>, vector<64x32xbf16>
    %cst_9 = arith.constant dense<0.000000e+00> : vector<8x32xf32>
    %18 = tpu.matmul %16, %17, %cst_9 {dimension_numbers = #tpu.dot_dimension_numbers<[1], [0], [0], [1], [0, 0, 1, 1], [], []>} : vector<8x64xbf16>, vector<64x32xbf16>, vector<8x32xf32> -> vector<8x32xf32>
    %19 = arith.addf %15, %18 : vector<8x32xf32>
    %c0_10 = arith.constant 0 : index
    %c0_11 = arith.constant 0 : index
    %20 = vector.load %arg6[%c0_10, %c0_11] : memref<8x32xf32, #tpu.memory_space<vmem>>, vector<8x32xf32>
    tpu.vector_store %arg6[%c0_10, %c0_11], %19 {strides = array<i32>} : memref<8x32xf32, #tpu.memory_space<vmem>>, vector<8x32xf32>,
    %c1_i32 = arith.constant 1 : i32
    %21 = arith.cmpi eq, %arg1, %c1_i32 : i32
    %22 = arith.extui %21 : i1 to i32
    %c0_i32_12 = arith.constant 0 : i32
    %23 = arith.cmpi ne, %22, %c0_i32_12 : i32
    scf.if %23 {
      %c0_13 = arith.constant 0 : index
      %c0_14 = arith.constant 0 : index
      %24 = vector.load %arg6[%c0_13, %c0_14] : memref<8x32xf32, #tpu.memory_space<vmem>>, vector<8x32xf32>
      %c0_15 = arith.constant 0 : index
      %c0_16 = arith.constant 0 : index
      %25 = vector.load %arg5[%c0_15, %c0_16] : memref<8x32xf32, #tpu.memory_space<vmem>>, vector<8x32xf32>
      tpu.vector_store %arg5[%c0_15, %c0_16], %24 {strides = array<i32>} : memref<8x32xf32, #tpu.memory_space<vmem>>, vector<8x32xf32>,
    } else {
    }
    return
  }
  func.func @transform_0(%arg0: i32, %arg1: i32) -> (i32, i32) {
    %c0_i32 = arith.constant 0 : i32
    %c0_i32_0 = arith.constant 0 : i32
    return %arg0, %c0_i32 : i32, i32
  }
  func.func @transform_1(%arg0: i32, %arg1: i32) -> (i32, i32) {
    %c0_i32 = arith.constant 0 : i32
    %c0_i32_0 = arith.constant 0 : i32
    return %c0_i32, %arg1 : i32, i32
  }
  func.func @transform_2(%arg0: i32, %arg1: i32) -> (i32, i32) {
    %c0_i32 = arith.constant 0 : i32
    %c0_i32_0 = arith.constant 0 : i32
    return %arg1, %c0_i32 : i32, i32
  }
  func.func @transform_3(%arg0: i32, %arg1: i32) -> (i32, i32) {
    %c0_i32 = arith.constant 0 : i32
    %c0_i32_0 = arith.constant 0 : i32
    return %arg0, %c0_i32 : i32, i32
  }
}

</mosaic_0001>

<bundles_post_ra>
// kernel: tpu_custom_call.1
= control target key start
LH: loop header
LB: loop body
LE: loop exit
PB: predicated region body
PF: predicated region fallthrough
CT: control target
= control target key end

     0   :  { %s1029_s0 = inlined_call_operand.vmem [shape: bf16[16,32], index: 0, kind: input, shape index: {}]   ;;  %s1030_s1 = inlined_call_operand.vmem [shape: bf16[32,256], index: 1, kind: input, shape index: {}]   ;;  %s1031_s2 = inlined_call_operand.vmem [shape: bf16[128,32], index: 2, kind: input, shape index: {}]   ;;  %s1032_s3 = inlined_call_operand.hbm [shape: f32[16,32], index: 3, kind: output, shape index: {}]  }
   0x1   :  { %1035 = sst [smem:[#allocation8_spill]] %s1030_s1 }
   0x2   :  { %8 = vsyncpa [#allocation5], 0 }
   0x3   :  { %10 = vsyncpa [#allocation5 + $0x1], 0  ;;  %s846_s12 = smov 0   ;;  %s848_s13 = smov 0  }
   0x4   :  { %s850_s14 = smov 0   ;;  %s852_s15 = smov 0  }
   0x5   :  { %s854_s16 = smov 0   ;;  %s856_s17 = smov 0  }
   0x6   :  { %s858_s18 = smov 0   ;;  %s860_s19 = smov 0  }
   0x7   :  { %s862_s20 = smov 0   ;;  %s864_s21 = smov 0  }
   0x8 LB: > { %s555_s22 = sadd.s32 4294967295, %s819_s21   ;;  %s556_s23 = sadd.s32 4294967294, %s819_s21   ;;  %s819_s21 = sphi %s864_s21, %s16_s21   ;;  %s815_s20 = sphi %s862_s20, %s1051_s20   ;;  %s811_s19 = sphi %s860_s19, %s1050_s19   ;;  %s807_s18 = sphi %s858_s18, %s1049_s18   ;;  %s803_s17 = sphi %s856_s17, %s1048_s17   ;;  %s799_s16 = sphi %s854_s16, %s1047_s16   ;;  %s795_s15 = sphi %s852_s15, %s1046_s15   ;;  %s791_s14 = sphi %s850_s14, %s1045_s14   ;;  %s787_s13 = sphi %s848_s13, %s1044_s13   ;;  %s783_s12 = sphi %s846_s12, %s1043_s12  }
   0x9   : > { %s25_s24 = sadd.s32 1, %s811_s19  ;;  %s28_s25 = sadd.s32 1, %s815_s20 }
   0xa   : > { %p26_p0 = scmp.ge.s32.totalorder %s25_s24, 2  ;;  %s61_s26 = sadd.s32 1, %s799_s16 }
   0xb   : > { %p68_p1 = scmp.ne.s32.totalorder %s799_s16, %s795_s15  ;;  %p69_p2 = scmp.eq.s32.totalorder %s819_s21, 0 }
   0xc   : > { %s1053_s24 = smov (%p26_p0, %s25_s24), 0  ;;  %s1055_s25 = smov (!%p26_p0, %s28_s25), %s815_s20 }
   0xd   : > { %s58_s27 = ssub.s32 %s811_s19, %s1053_s24  ;;  %p909_p3 = por %p69_p2, %p68_p1 }
   0xe   : > { %p30_p4 = scmp.ge.s32.totalorder %s1055_s25, 2  ;;  %p59_p5 = scmp.eq.s32.totalorder %s58_s27, 0 }
   0xf   : > { %s113_s29 = sadd.s32 1, %s791_s14  ;;  %p123_p6 = scmp.ne.s32.totalorder %s791_s14, %s787_s13 }
  0x10   : > { %s1057_s25 = smov (%p30_p4, %s1055_s25), 0  ;;  %p124_p7 = scmp.eq.s32.totalorder %s555_s22, 3 }
  0x11   : > { %1037 = sst [smem:[#allocation7_spill]] %s1057_s25  ;;  %s110_s4 = ssub.s32 %s815_s20, %s1057_s25 }
  0x12   : > { %s919_s30 = scalar_select %p59_p5, %s799_s16, %s61_s26  }
  0x13   : > { %p111_p8 = scmp.eq.s32.totalorder %s110_s4, 0  ;;  %p129_p9 = scmp.ne.s32.totalorder %s787_s13, %s783_s12 }
  0x14   : > { %p925_p10 = por %p124_p7, %p123_p6  ;;  %p130_p11 = scmp.eq.s32.totalorder %s556_s23, 3 }
  0x15   : > { %s930_s6 = scalar_select %p111_p8, %s791_s14, %s113_s29  }
  0x16   : > { %p932_p12 = por %p130_p11, %p129_p9  ;;  %p558_p13 = scmp.ge.s32.totalorder %s819_s21, 4 }
  0x18   : > { %146 = sbr.rel (%p558_p13) target bundleno = 41 (0x29), region = 16 }
  0x1d   : > { %156 = sbr.rel (!%p909_p3) target bundleno = 41 (0x29), region = 24  ;;  %s158_s8 = sand.u32 (%p909_p3), 1, %s799_s16  }
  0x1e   : > { %s560_s9 = sshll.u32 (%p909_p3), %s811_s19, 2  ;;  %s559_s10 = sshll.u32 (%p909_p3), %s158_s8, 4 }
  0x1f   : > { %s1040_s1 = sld [smem:[#allocation8_spill]] (%p909_p3)  ;;  %s160_s26 = scalar_lea.vmem (%p909_p3), [#allocation3], %s559_s10 }
  0x25   : > { %s162_s23 = scalar_lea.vmem %s1040_s1, %s560_s9 }
  0x26   : > { %v179_v0 = vld [vmem:[%s162_s23] sm:$0xf]  ;;  %v181_v1 = vld [vmem:[%s162_s23 + $0x8] sm:$0xf]  ;;  %v183_v2 = vld [vmem:[%s162_s23 + $0x10] sm:$0xf] }
  0x27   : > { %180 = vst [vmem:[%s160_s26] sm:$0xf] %v179_v0  ;;  %182 = vst [vmem:[%s160_s26 + $0x4] sm:$0xf] %v181_v1  ;;  %v185_v3 = vld [vmem:[%s162_s23 + $0x18] sm:$0xf] }
  0x28   : > { %184 = vst [vmem:[%s160_s26 + $0x8] sm:$0xf] %v183_v2  ;;  %186 = vst [vmem:[%s160_s26 + $0xc] sm:$0xf] %v185_v3 }
  0x29 PF: > { %p561_p0 = scmp.ge.s32.totalorder %s819_s21, 1  ;;  %p226_p1 = scmp.lt.s32.totalorder %s819_s21, 5 }
  0x2b   : > { %p227_p2 = pnand %p561_p0, %p226_p1 }
  0x2c   : > { %s233_s27 = sand.u32 (!%p227_p2), 1, %s795_s15   ;;  %s1034_s28 = sand.u32 (!%p227_p2), 1, %s787_s13  }
  0x2d   : > { %230 = sbr.rel (%p227_p2) target bundleno = 607 (0x25f), region = 69  ;;  %s562_s29 = sshll.u32 (!%p227_p2), %s233_s27, 4 }
  0x2e   : > { %s950_s4 = sshll.u32 (!%p227_p2), %s1034_s28, 3  ;;  %p265_p3 = scmp.lt.s32.totalorder (!%p227_p2), %s807_s18, 1 }
  0x2f   : > { %s565_s8 = sshll.u32 (!%p227_p2), %s803_s17, 3  ;;  %s235_s27 = scalar_lea.vmem (!%p227_p2), [#allocation3], %s562_s29 }
  0x30   : > { %p270_p4 = scmp.lt.s32.totalorder (!%p227_p2), %s565_s8, 15  ;;  %s264_s28 = scalar_lea.vmem (!%p227_p2), [#allocation4], %s950_s4 }
  0x31   : > { %p567_p5 = scmp.ne.s32.totalorder (!%p227_p2), %s803_s17, 0 }
  0x32   : > { %s266_s9 = scalar_select %p265_p3, %s807_s18, 1 }
  0x33   : > { %s1059_s8 = smov (!%p270_p4, %s565_s8), 15  ;;  %279 = sbr.rel (%p567_p5) target bundleno = 58 (0x3a), region = 77 }
  0x34   : > { %s564_s10 = sshll.u32 %s266_s9, 2  ;;  %s566_s26 = sshll.u32 %s1059_s8, 2 }
  0x35   : > { %s268_s23 = scalar_lea.vmem %s1029_s0, %s564_s10  ;;  %s961_s15 = scalar_lea.vmem %s1031_s2, %s566_s26 }
  0x38   : > { %vm280_vm0 = vcmask 261120   ;;  %v821_v4 = vmov 0.0  }
  0x39   : > { %281 = vst.msk [vmem:[#allocation2] sm:$0xff] %vm280_vm0, %v821_v4 }
  0x3a PF: > { %v701_v5 = vld [vmem:[%s235_s27 + $0x8] sm:$0xff]   ;;  %v822_v6 = vmov 0.0   ;;  %v702_v7 = vld [vmem:[%s235_s27] sm:$0xff]   ;;  %vm823_vm1 = vmmov 0   ;;  %vm299_vm2 = vcmask 261120   ;;  %s824_s1 = smov 64  }
  0x3b   : > { %590 = vmatprep.subr.bf16.mxu0 %v822_v6  ;;  %598 = vmatprep.subr.bf16.mxu1 %v822_v6  ;;  %v282_v8 = vld [vmem:[%s268_s23] sm:$0xf]  ;;  %v703_v9 = vld [vmem:[%s961_s15 + $0x18] sm:$0xff]   ;;  %v704_v10 = vld [vmem:[%s961_s15 + $0x10] sm:$0xff]   ;;  %vm389_vm3 = vcmask 523264   ;;  %p577_p6 = scmp.ne.s32.totalorder %s803_s17, 1 }
  0x3c   : > { %591 = vmatpush3.bf16.msra.mxu0 %v701_v5  ;;  %594 = vmatprep.mubr.msk.bf16.mxu0 %vm823_vm1, %v822_v6  ;;  %v705_v11 = vld [vmem:[%s961_s15 + $0x8] sm:$0xff]   ;;  %v706_v12 = vld [vmem:[%s961_s15] sm:$0xff]  }
  0x3d   : > { %592 = vmatprep.subr.bf16.mxu0 %v822_v6  ;;  %606 = vmatprep.mubr.msk.bf16.mxu1 %vm823_vm1, %v822_v6 }
  0x3e   : > { %599 = vmatpush3.bf16.msra.mxu1 %v703_v9 }
  0x3f   : > { %600 = vmatprep.subr.bf16.mxu1 %v822_v6 }
  0x40   : > { %593 = vmatpush3.bf16.msra.mxu0 %v702_v7  ;;  %v355_v25 = vld [vmem:[#allocation2] sm:$0xff] }
  0x42   : > { %601 = vmatpush3.bf16.msra.mxu1 %v704_v10 }
  0x43   : > { %595 = vmatmul.mubr.msk.bf16.vlgmr.msra.gmra.mxu0 %vm299_vm2, %v282_v8  ;;  %602 = vmatprep.subr.bf16.mxu1 %v822_v6 }
  0x46   : > { %603 = vmatpush3.bf16.msra.mxu1 %v705_v11 }
  0x47   : > { %604 = vmatprep.subr.bf16.mxu1 %v822_v6 }
  0x4a   : > { %605 = vmatpush3.bf16.msra.mxu1 %v706_v12 }
 0x103   : > { %v337_v13 = vpop.f32.mrf.mxu0 }
 0x104   : > { %351 = vrot.lane.b32.xlu0 %v337_v13, %s824_s1  ;;  %v571_v17 = vmul.f32 -1.442695, %v337_v13 }
 0x105   : > { %v596_v14 = vpop.f32.mrf.mxu0 }
 0x106   : > { %707 = vpow2.f32 %v571_v17 }
 0x107   : > { %v340_v15 = vpop.f32.mrf.mxu0 }
 0x109   : > { %v597_v16 = vpop.f32.mrf.mxu0 }
 0x113   : > { %v708_v18 = vpop.eup %707 }
 0x114   : > { %v346_v19 = vadd.f32 1.0, %v708_v18 }
 0x116   : > { %709 = vrcp.f32 %v346_v19 }
 0x123   : > { %v710_v20 = vpop.eup %709 }
 0x124   : > { %v349_v21 = vmul.f32 %v710_v20, %v337_v13 }
 0x176   : > { %v352_v22 = vpop.permute.xlu0 %351 }
 0x177   : > { %v354_v23 = vmul.f32 %v352_v22, %v349_v21 }
 0x179   : > { %v356_v24 = vpack.c.bf16 %v354_v23, %v354_v23 }
 0x17b   : > { %607 = vmatmul.mubr.msk.bf16.vlgmr.msra.gmra.mxu1 %vm389_vm3, %v356_v24 }
 0x23b   : > { %v427_v26 = vpop.f32.mrf.mxu1 }
 0x23c   : > { %v433_v27 = vadd.f32 %v427_v26, %v355_v25 }
 0x23d   : > { %v608_v28 = vpop.f32.mrf.mxu1  ;;  %438 = sbr.rel (%p577_p6) target bundleno = 583 (0x247), region = 81 }
 0x23e   : > { %434 = vst.msk [vmem:[#allocation2] sm:$0xff] %vm299_vm2, %v433_v27 }
 0x23f   : > { %v430_v29 = vpop.f32.mrf.mxu1 }
 0x241   : > { %v609_v30 = vpop.f32.mrf.mxu1 }
 0x245   : > { %v439_v31 = vld [vmem:[#allocation2] sm:$0xff] }
 0x246   : > { %440 = vst.msk [vmem:[%s264_s28] sm:$0xff] %vm299_vm2, %v439_v31 }
 0x247 PF: > { %s579_s25 = sshll.u32 %s807_s18, 7  ;;  %s455_s10 = sshll.u32 %s264_s28, 4  ;;  %s456_s10 = int_to_ptr.vmem [resolvable:$true] %s455_s10 }
 0x248   : > { %s453_s9 = scalar_lea.hbm %s1032_s3, %s579_s25  ;;  %s1041_s17 = sand.u32 1, %s787_s13  }
 0x249   : > { %s442_s11 = scalar_lea.sflag [#allocation5], %s1041_s17  ;;  %s711_s22 = scalar_lea.vmem %s456_s10, 128 }
 0x24a   : > { %p712_p7 = scmp.ne.s32.totalorder %s456_s10, %s711_s22  ;;  %s825_s23 = smov [#allocation4]  }
 0x24b   : > { %s715_s26 = sshll.u32 %s825_s23, 4  ;;  %s716_s26 = int_to_ptr.vmem [resolvable:$false] %s715_s26 }
 0x24c   : > { %p713_p8 = pnand %p712_p7, %p925_p10  ;;  %s717_s15 = scalar_lea.vmem %s716_s26, 256 }
 0x24d   : > { %p718_p11 = scmp.lt.s32.totalorder %s456_s10, %s716_s26  ;;  %p719_p13 = scmp.lt.s32.totalorder %s717_s15, %s711_s22 }
 0x24e   : > { %p714_p9 = pneg %p713_p8 }
 0x24f   : > { %p720_p0 = por %p719_p13, %p718_p11 }
 0x251   : > { %p721_p1 = pnand %p720_p0, %p714_p9 }
 0x253   : > { %724 = shalt.err (!%p721_p1)
}
 0x254   : > { %s725_s18 = scalar_lea.hbm %s453_s9, 128  ;;  %s729_s27 = scalar_lea.hbm %s1032_s3, 256 }
 0x255   : > { %p726_p2 = scmp.ne.s32.totalorder %s453_s9, %s725_s18  ;;  %p730_p5 = scmp.lt.s32.totalorder %s453_s9, %s1032_s3 }
 0x256   : > { %p731_p6 = scmp.lt.s32.totalorder %s729_s27, %s725_s18 }
 0x257   : > { %p727_p3 = pnand %p726_p2, %p925_p10 }
 0x258   : > { %p732_p7 = por %p731_p6, %p730_p5 }
 0x259   : > { %p728_p4 = pneg %p727_p3 }
 0x25b   : > { %p733_p8 = pnand %p732_p7, %p728_p4 }
 0x25d   : > { %736 = shalt.err (!%p733_p8)
}
 0x25e   : > { %610 = dma.vmem_to_hbm [thread:$0]  (%p925_p10), %s456_s10, 128, %s453_s9, %s442_s11  }
 0x25f PF: > { %p616_p9 = scmp.ge.s32.totalorder %s819_s21, 2  ;;  %s467_s29 = sand.u32 1, %s783_s12  }
 0x260   : > { %s468_s8 = scalar_lea.sflag [#allocation5], %s467_s29 }
 0x261   : > { %p613_p11 = pnand %p616_p9, %p932_p12 }
 0x263   : > { %p614_p13 = pneg %p613_p11 }
 0x265   : > { %778 = dma.done.wait (%p614_p13), %s468_s8, 128  }
 0x266   : > { %780 = vsyncadd (%p614_p13), %s468_s8, 4294967168  ;;  %s16_s21 = sadd.s32 1, %s819_s21   ;;  %s1042_s5 = sld [smem:[#allocation7_spill]] }
 0x267   : > { %p13_p0 = scmp.ge.s32.totalorder %s16_s21, 6   ;;  %s1043_s12 = smov %s787_s13 }
 0x268   : > { %s1044_s13 = smov %s791_s14  ;;  %s1045_s14 = smov %s930_s6 }
 0x269   : > { %s1046_s15 = smov %s799_s16  ;;  %s1047_s16 = smov %s919_s30 }
 0x26a   : > { %s1048_s17 = smov %s811_s19  ;;  %s1049_s18 = smov %s815_s20 }
 0x26b   : > { %s1050_s19 = smov %s1053_s24  ;;  %15 = sbr.rel (!%p13_p0) target bundleno = 8 (0x8), region = 127 }
 0x26c   : > { %s1051_s20 = smov %s1042_s5 }
 0x270   :  { %473 = vsyncpa [#allocation5], 1 }
 0x271   :  { %475 = vsyncpa [#allocation5 + $0x1], 1 }

</bundles_post_ra>
